<compile_context>
chip_gen: v6e
topology: v6e:2x2x1
jax: 0.10.0
libtpu: 0.0.40
codegen_flags: <defaults>
</compile_context>

<pallas_src>
import functools

import jax
import jax.numpy as jnp
from jax.experimental import pallas as pl
from jax.experimental.pallas import tpu as pltpu


def _sample_module_kernel(x_ref, pvec_ref, o_ref, *, has_submodule: bool):
    """Elementwise hot path on a lane-dense (tile_rows, 384) block."""
    x = x_ref[...]                     # (tr, 384)
    pv = pvec_ref[...]                 # (1, 384) resident param constant
    t = x + pv                         # single (submodule-less) forward
    if has_submodule:                  # static Python branch (trace time)
        t = t + t                      # x + c + submodule(x) == 2*(x + c)
    o_ref[...] = t


def _round_up(a: int, m: int) -> int:
    return ((a + m - 1) // m) * m


def sample_module_forward(x, param, *, has_parity=True, has_submodule=True):
    """Pallas forward for SampleModule. x: [..., 3, 4] (any leading batch dims),
    param: (3, 4). Flags are Python-static."""
    lane_w = 384                       # lcm(param.size=12, 128 lanes)
    dtype = x.dtype

    # Per-element param contribution of one submodule-less forward, tiled to
    # one lane-dense row. Computed ONCE in the wrapper (12 -> 384 elements).
    if has_parity:
        pconst = param * 2.0
    else:
        pconst = param * 4.0 + 3.0
    pvec = jnp.tile(pconst.reshape(-1), lane_w // param.size)
    pvec = pvec.reshape(1, lane_w).astype(dtype)

    # Flatten x into a [rows_padded, 384] slab (zero-padded tail, sliced off
    # after the call). Row tiles of up to 512 rows, multiple of 8 sublanes.
    n = x.size
    rows = pl.cdiv(n, lane_w)
    tile_rows = min(512, _round_up(rows, 8))
    rows_padded = _round_up(rows, tile_rows)
    flat = jnp.pad(x.reshape(-1), (0, rows_padded * lane_w - n))
    x2d = flat.reshape(rows_padded, lane_w)

    kernel = functools.partial(_sample_module_kernel,
                               has_submodule=has_submodule)
    out2d = pl.pallas_call(
        kernel,
        out_shape=jax.ShapeDtypeStruct((rows_padded, lane_w), dtype),
        grid=(rows_padded // tile_rows,),
        in_specs=[
            pl.BlockSpec((tile_rows, lane_w), lambda i: (i, 0)),
            pl.BlockSpec((1, lane_w), lambda i: (0, 0)),   # resident constant
        ],
        out_specs=pl.BlockSpec((tile_rows, lane_w), lambda i: (i, 0)),
        compiler_params=pltpu.CompilerParams(
            dimension_semantics=("parallel",)),
    )(x2d, pvec)

    return out2d.reshape(-1)[:n].reshape(x.shape)


def _reference(x, param, *, has_parity=True, has_submodule=True):
    sub = 0.0
    if has_submodule:
        sub = (x + param * 2.0) if has_parity else (x + param * 4.0 + 3.0)
    if has_parity:
        return x + param * 2.0 + sub
    return x + param * 4.0 + sub + 3.0


if __name__ == "__main__":
    key = jax.random.PRNGKey(0)

    # Module state per reset_parameters(): param.fill_(1); buffer.fill_(1); attr=10.
    param = jnp.ones((3, 4), dtype=jnp.float32)
    buffer = jnp.ones((4, 5), dtype=jnp.float32)  # noqa: F841  (unused in forward)

    # Small shape consistent with the module: batch=2 over the (3, 4) param.
    x_small = jax.random.normal(key, (2, 3, 4), dtype=jnp.float32)
    out = jax.block_until_ready(
        sample_module_forward(x_small, param, has_parity=True, has_submodule=True))
    ref = _reference(x_small, param, has_parity=True, has_submodule=True)
    assert out.shape == ref.shape and out.dtype == ref.dtype
    assert jnp.allclose(out, ref, atol=1e-6), "mismatch (parity, submodule)"

    # Larger batch: exercises the multi-step tiled grid / pipelined DMA path.
    x_big = jax.random.normal(jax.random.PRNGKey(1), (65536, 3, 4), dtype=jnp.float32)
    out_big = jax.block_until_ready(
        sample_module_forward(x_big, param, has_parity=True, has_submodule=True))
    ref_big = _reference(x_big, param, has_parity=True, has_submodule=True)
    assert jnp.allclose(out_big, ref_big, atol=1e-6), "mismatch (large batch)"

    # Non-parity branch (param would have +10 from reset_parameters).
    out_np = jax.block_until_ready(
        sample_module_forward(x_small, param + 10.0, has_parity=False,
                              has_submodule=True))
    ref_np = _reference(x_small, param + 10.0, has_parity=False, has_submodule=True)
    assert jnp.allclose(out_np, ref_np, atol=1e-6), "mismatch (non-parity)"

    # No-submodule branch.
    out_ns = jax.block_until_ready(
        sample_module_forward(x_small, param, has_parity=True, has_submodule=False))
    ref_ns = _reference(x_small, param, has_parity=True, has_submodule=False)
    assert jnp.allclose(out_ns, ref_ns, atol=1e-6), "mismatch (no submodule)"

    print("KERNEL_OK")
</pallas_src>

<mosaic_0001>
module attributes {stable_mosaic.version = 11 : i64} {
  func.func @_sample_module_kernel(%arg0: i32, %arg1: memref<8x384xf32, #tpu.memory_space<vmem>>, %arg2: memref<1x384xf32, #tpu.memory_space<vmem>>, %arg3: memref<8x384xf32, #tpu.memory_space<vmem>>) attributes {dimension_semantics = [#tpu.dimension_semantics<parallel>], iteration_bounds = array<i64: 1>, scalar_prefetch = 0 : i64, scratch_operands = 0 : i64, tpu.core_type = #tpu.core_type<tc>, window_params = [{transform_indices = @transform_0, window_bounds = array<i64: 8, 384>}, {pipeline_mode = #tpu.pipeline_mode<synchronous>, transform_indices = @transform_1, window_bounds = array<i64: 1, 384>}, {transform_indices = @transform_2, window_bounds = array<i64: 8, 384>}]} {
    %c0 = arith.constant 0 : index
    %c0_0 = arith.constant 0 : index
    %0 = vector.load %arg1[%c0, %c0_0] : memref<8x384xf32, #tpu.memory_space<vmem>>, vector<8x384xf32>
    %c0_1 = arith.constant 0 : index
    %c0_2 = arith.constant 0 : index
    %1 = vector.load %arg2[%c0_1, %c0_2] : memref<1x384xf32, #tpu.memory_space<vmem>>, vector<1x384xf32>
    %2 = vector.broadcast %1 : vector<1x384xf32> to vector<8x384xf32>
    %3 = arith.addf %0, %2 : vector<8x384xf32>
    %4 = arith.addf %3, %3 : vector<8x384xf32>
    %c0_3 = arith.constant 0 : index
    %c0_4 = arith.constant 0 : index
    %5 = vector.load %arg3[%c0_3, %c0_4] : memref<8x384xf32, #tpu.memory_space<vmem>>, vector<8x384xf32>
    tpu.vector_store %arg3[%c0_3, %c0_4], %4 {strides = array<i32>} : memref<8x384xf32, #tpu.memory_space<vmem>>, vector<8x384xf32>,
    return
  }
  func.func @transform_0(%arg0: i32) -> (i32, i32) {
    %c0_i32 = arith.constant 0 : i32
    %c0_i32_0 = arith.constant 0 : i32
    return %arg0, %c0_i32 : i32, i32
  }
  func.func @transform_1(%arg0: i32) -> (i32, i32) {
    %c0_i32 = arith.constant 0 : i32
    %c0_i32_0 = arith.constant 0 : i32
    %c0_i32_1 = arith.constant 0 : i32
    return %c0_i32, %c0_i32_0 : i32, i32
  }
  func.func @transform_2(%arg0: i32) -> (i32, i32) {
    %c0_i32 = arith.constant 0 : i32
    %c0_i32_0 = arith.constant 0 : i32
    return %arg0, %c0_i32 : i32, i32
  }
}

</mosaic_0001>

<bundles_post_ra>
// kernel: tpu_custom_call.1
= control target key start
LH: loop header
LB: loop body
LE: loop exit
PB: predicated region body
PF: predicated region fallthrough
CT: control target
= control target key end

     0   :  { %7 = vsyncpa [#allocation3], 0  ;;  %s177_s0 = inlined_call_operand.hbm [shape: f32[8,384], index: 0, kind: input, shape index: {}]   ;;  %s178_s1 = inlined_call_operand.hbm [shape: f32[1,384], index: 1, kind: input, shape index: {}]   ;;  %s179_s2 = inlined_call_operand.hbm [shape: f32[8,384], index: 2, kind: output, shape index: {}]  }
   0x1   :  { %8 = vsyncpa [#allocation6], 0 }
   0x2   :  { %9 = vsyncpa [#allocation4], 0  ;;  %s150_s9 = smov [#allocation2]   ;;  %s151_s11 = smov [#allocation5]  }
   0x3   :  { %s16_s10 = sshll.u32 %s150_s9, 4  ;;  %s26_s12 = sshll.u32 %s151_s11, 4  ;;  %s17_s10 = int_to_ptr.vmem [resolvable:$true] %s16_s10  ;;  %s27_s12 = int_to_ptr.vmem [resolvable:$true] %s26_s12 }
   0x4   :  { %s92_s13 = scalar_lea.vmem %s17_s10, 384  ;;  %p97_p1 = scmp.lt.s32.totalorder %s17_s10, %s17_s10 }
   0x5   :  { %p93_p0 = scmp.ne.s32.totalorder %s17_s10, %s92_s13  ;;  %p98_p2 = scmp.lt.s32.totalorder %s92_s13, %s92_s13 }
   0x7   :  { %p99_p3 = por %p98_p2, %p97_p1 }
   0x9   :  { %p100_p4 = pnand %p99_p3, %p93_p0 }
   0xb   :  { %103 = shalt.err (!%p100_p4)
}
   0xc   :  { %19 = dma.hbm_to_vmem [thread:$0]  %s177_s0, 384, %s17_s10, [#allocation3]  }
   0xd   :  { %s112_s16 = scalar_lea.vmem %s27_s12, 48  ;;  %s116_s17 = scalar_lea.vmem %s27_s12, 64 }
   0xe   :  { %p113_p5 = scmp.ne.s32.totalorder %s27_s12, %s112_s16  ;;  %p117_p6 = scmp.lt.s32.totalorder %s27_s12, %s27_s12 }
   0xf   :  { %p118_p7 = scmp.lt.s32.totalorder %s116_s17, %s112_s16 }
  0x11   :  { %p119_p8 = por %p118_p7, %p117_p6 }
  0x13   :  { %p120_p9 = pnand %p119_p8, %p113_p5 }
  0x15   :  { %123 = shalt.err (!%p120_p9)
}
  0x16   :  { %29 = dma.hbm_to_vmem [thread:$0]  %s178_s1, 48, %s27_s12, [#allocation6]  }
  0x17   :  { %144 = dma.done.wait [#allocation3], 384  }
  0x18   :  { %145 = vsyncadd [#allocation3], 4294966912 }
  0x19   :  { %146 = dma.done.wait [#allocation6], 48  }
  0x1a   :  { %147 = vsyncadd [#allocation6], 4294967248  ;;  %v41_v0 = vlaneseq  ;;  %v36_v5 = vld [vmem:[#allocation2] sm:$0xff]  ;;  %v39_v6 = vld [vmem:[#allocation5] sm:$0x7]  ;;  %s152_s0 = smov [#allocation7]  }
  0x1b   :  { %v37_v7 = vld [vmem:[#allocation2 + $0x8] sm:$0xff]  ;;  %v38_v10 = vld [vmem:[#allocation2 + $0x10] sm:$0xff]  ;;  %s71_s20 = sshll.u32 %s152_s0, 4  ;;  %s72_s20 = int_to_ptr.vmem [resolvable:$true] %s71_s20 }
  0x1c   :  { %v42_v1 = vshrl.u32 %v41_v0, 7  ;;  %s124_s1 = scalar_lea.vmem %s72_s20, 384  ;;  %p129_p11 = scmp.lt.s32.totalorder %s72_s20, %s72_s20 }
  0x1d   :  { %p125_p10 = scmp.ne.s32.totalorder %s72_s20, %s124_s1  ;;  %p130_p12 = scmp.lt.s32.totalorder %s124_s1, %s124_s1 }
  0x1e   :  { %v43_v2 = vsub.s32 0, %v42_v1  ;;  %v47_v3 = vsub.s32 1, %v42_v1  ;;  %v51_v4 = vsub.s32 2, %v42_v1 }
  0x1f   :  { %p131_p13 = por %p130_p12, %p129_p11 }
  0x20   :  { %v44_v8 = vrot.slane %v39_v6, %v43_v2  ;;  %v48_v9 = vrot.slane %v39_v6, %v47_v3  ;;  %v52_v11 = vrot.slane %v39_v6, %v51_v4 }
  0x21   :  { %p132_p0 = pnand %p131_p13, %p125_p10 }
  0x22   :  { %v56_v12 = vadd.f32 %v44_v8, %v36_v5  ;;  %v57_v13 = vadd.f32 %v48_v9, %v37_v7  ;;  %v58_v14 = vadd.f32 %v52_v11, %v38_v10 }
  0x24   :  { %v59_v15 = vadd.f32 %v56_v12, %v56_v12  ;;  %v60_v16 = vadd.f32 %v57_v13, %v57_v13  ;;  %v61_v17 = vadd.f32 %v58_v14, %v58_v14 }
  0x26   :  { %62 = vst [vmem:[#allocation7] sm:$0xff] %v59_v15  ;;  %63 = vst [vmem:[#allocation7 + $0x8] sm:$0xff] %v60_v16 }
  0x27   :  { %64 = vst [vmem:[#allocation7 + $0x10] sm:$0xff] %v61_v17 }
  0x28   :  { %135 = shalt.err (!%p132_p0)
}
  0x29   :  { %74 = dma.vmem_to_hbm [thread:$0]  %s72_s20, 384, %s179_s2, [#allocation4]  }
  0x2a   :  { %148 = dma.done.wait [#allocation4], 384  }
  0x2b   :  { %149 = vsyncadd [#allocation4], 4294966912 }
  0x2c   :  { %78 = vsyncpa [#allocation3], 1 }
  0x2d   :  { %79 = vsyncpa [#allocation6], 1 }
  0x2e   :  { %80 = vsyncpa [#allocation4], 1 }

</bundles_post_ra>
